<compile_context>
chip_gen: v7x
topology: tpu7x:2x2x1
jax: 0.10.0
libtpu: 0.0.40
codegen_flags: <defaults>
</compile_context>

<pallas_src>
import jax
import jax.numpy as jnp
from jax.experimental import pallas as pl
from jax.experimental.pallas import tpu as pltpu


def _round_up(n, m):
    return ((n + m - 1) // m) * m


def _pad_to(a, shape, dtype):
    pads = [(0, s - d) for d, s in zip(a.shape, shape)]
    return jnp.pad(a.astype(dtype), pads)


def _vmem_bytes_2d(rows, cols, dtype):
    """Approximate VMEM footprint of one (rows, cols) block: lane dim padded to
    128, sublane dim padded to the dtype's packed tile (8 for f32, 16 for bf16)."""
    itemsize = jnp.dtype(dtype).itemsize
    sub = 8 * max(1, 4 // itemsize)
    return _round_up(rows, sub) * _round_up(cols, 128) * itemsize


def _q_kernel(x_ref, a_ref, w1x_ref, w1a_ref, b1_ref, w2_ref, b2_ref, w3_ref,
              sb_ref, out_ref):
    # Layer 1 with fused concat: (Tb, Dx)@(Dx, H) + (Tb, Da)@(Da, H) + (1, H).
    # Operands are compute_dtype (bf16 by default), accumulation is f32.
    h1 = (jnp.dot(x_ref[...], w1x_ref[...], preferred_element_type=jnp.float32)
          + jnp.dot(a_ref[...], w1a_ref[...], preferred_element_type=jnp.float32)
          + b1_ref[...])
    # Layer 2: (Tb, H)@(H, H) + (1, H).  h1 cast to the weight dtype (no-op for f32).
    h2 = jnp.dot(h1.astype(w2_ref.dtype), w2_ref[...],
                 preferred_element_type=jnp.float32) + b2_ref[...]
    # Layer 3 (no per-feature bias), kept fully in f32: (Tb, H)@(H, O) with O = the
    # real num_options (no 16x lane padding of the output write stream).
    q = jnp.dot(h2, w3_ref[...], preferred_element_type=jnp.float32)
    # SingleSharedBias: one scalar, read from SMEM, added to every q-value.
    out_ref[...] = (q + sb_ref[0, 0]).astype(out_ref.dtype)


def option_linear_q_forward(action_output, x, params, *, tile_b_max=4096,
                            compute_dtype=jnp.bfloat16):
    """action_output: (B, action_vector_size), x: (B, in_features).

    compute_dtype: dtype of the layer-1/2 matmul operands (bf16 default for
    bandwidth; pass jnp.float32 for an exact match of the PyTorch f32 module).
    Layer 3 and all accumulations are always f32.
    """
    w1, b1, w2, b2, w3, shared_bias = params
    B, d_x = x.shape
    d_a = action_output.shape[1]
    H = w1.shape[1]
    num_options = w3.shape[1]

    itemsize_c = jnp.dtype(compute_dtype).itemsize

    # Lane-dense hidden size (zero padding keeps the math exact).  Do NOT pad to
    # 256: the kernel is memory/step-overhead bound, not MXU-bound.
    h_pad = _round_up(H, 128)

    # ---- VMEM budget: resident weights (double-buffered by the pipeline) +
    # per-batch-row activation/output bytes (lane-padded, double-buffered). ----
    weights_vmem = 2 * (_vmem_bytes_2d(d_x, h_pad, compute_dtype)
                        + _vmem_bytes_2d(d_a, h_pad, compute_dtype)
                        + _vmem_bytes_2d(1, h_pad, jnp.float32) * 2
                        + _vmem_bytes_2d(h_pad, h_pad, compute_dtype)
                        + _vmem_bytes_2d(h_pad, num_options, jnp.float32))
    per_row_vmem = 2 * ((_round_up(d_x, 128) + _round_up(d_a, 128)) * itemsize_c
                        + _round_up(num_options, 128) * 4)
    budget = 24 * 1024 * 1024  # safe on v5e/v6e/v7x once vmem_limit_bytes is raised
    tile_cap = max(16, ((budget - weights_vmem) // per_row_vmem) // 16 * 16)
    tile_b_max = max(16, min(tile_b_max, tile_cap))

    # ---- Batch tiling: multiples of 16 (bf16 sublane packing), last tile not
    # mostly padding, and >= 2 (even) grid steps when there is enough work so the
    # "parallel" grid axis actually shards across both TensorCores on v7x. ----
    b16 = _round_up(max(B, 1), 16)
    n_tiles = pl.cdiv(b16, tile_b_max)
    if b16 >= 32:
        n_tiles = max(n_tiles, 2)
    if n_tiles > 1 and n_tiles % 2:
        n_tiles += 1
    tile_b = _round_up(pl.cdiv(b16, n_tiles), 16)
    b_pad = tile_b * n_tiles
    grid = (n_tiles,)

    # Split w1 into x-part and action-part (concat order is x first).
    w1x, w1a = w1[:d_x], w1[d_x:]

    # Pack operands.  Layers 1/2 operands in compute_dtype; biases, layer-3 weight
    # and output stay f32.  Padded batch rows produce garbage (they still get the
    # biases) but are sliced off below — exact for the real rows.
    x_p = _pad_to(x, (b_pad, d_x), compute_dtype)
    a_p = _pad_to(action_output, (b_pad, d_a), compute_dtype)
    w1x_p = _pad_to(w1x, (d_x, h_pad), compute_dtype)
    w1a_p = _pad_to(w1a, (d_a, h_pad), compute_dtype)
    b1_p = _pad_to(b1.reshape(1, -1), (1, h_pad), jnp.float32)
    w2_p = _pad_to(w2, (h_pad, h_pad), compute_dtype)
    b2_p = _pad_to(b2.reshape(1, -1), (1, h_pad), jnp.float32)
    w3_p = _pad_to(w3, (h_pad, num_options), jnp.float32)
    sb_p = jnp.asarray(shared_bias, jnp.float32).reshape(1, 1)

    flops = 2 * b_pad * (d_x * h_pad + d_a * h_pad + h_pad * h_pad
                         + h_pad * num_options)
    bytes_accessed = ((x_p.size + a_p.size + w1x_p.size + w1a_p.size
                       + w2_p.size) * itemsize_c
                      + (b1_p.size + b2_p.size + w3_p.size + 1) * 4
                      + b_pad * num_options * 4)
    cost = pl.CostEstimate(flops=flops, transcendentals=0,
                           bytes_accessed=bytes_accessed)

    # Explicit VMEM limit sized from the actual footprint (review: v5e default
    # scoped VMEM is only 16 MiB) plus slack for compiler scratch.
    vmem_limit = int(weights_vmem + per_row_vmem * tile_b + (4 << 20))

    # Activation/output tiles walk the batch grid; weights/biases stay resident
    # (constant index_map -> no re-fetch); shared bias is a scalar in SMEM.
    q_pad = pl.pallas_call(
        _q_kernel,
        out_shape=jax.ShapeDtypeStruct((b_pad, num_options), jnp.float32),
        grid=grid,
        in_specs=[
            pl.BlockSpec((tile_b, d_x), lambda i: (i, 0)),
            pl.BlockSpec((tile_b, d_a), lambda i: (i, 0)),
            pl.BlockSpec((d_x, h_pad), lambda i: (0, 0)),
            pl.BlockSpec((d_a, h_pad), lambda i: (0, 0)),
            pl.BlockSpec((1, h_pad), lambda i: (0, 0)),
            pl.BlockSpec((h_pad, h_pad), lambda i: (0, 0)),
            pl.BlockSpec((1, h_pad), lambda i: (0, 0)),
            pl.BlockSpec((h_pad, num_options), lambda i: (0, 0)),
            pl.BlockSpec((1, 1), lambda i: (0, 0),
                         memory_space=pltpu.MemorySpace.SMEM),
        ],
        out_specs=pl.BlockSpec((tile_b, num_options), lambda i: (i, 0)),
        compiler_params=pltpu.CompilerParams(
            dimension_semantics=("parallel",),
            vmem_limit_bytes=vmem_limit),
        cost_estimate=cost,
    )(x_p, a_p, w1x_p, w1a_p, b1_p, w2_p, b2_p, w3_p, sb_p)

    # Strip batch padding (output last dim is already exactly num_options).
    return q_pad[:B]


def init_params(key, in_features, action_vector_size, num_options, hidden_size=64):
    """Deterministic synthetic init mimicking chainer-default (LeCunNormal W, zero b)."""
    d_in = in_features + action_vector_size
    k1, k2, k3 = jax.random.split(key, 3)
    # weights stored as (in, out) — i.e. the transpose of PyTorch's (out, in)
    w1 = jax.random.normal(k1, (d_in, hidden_size), jnp.float32) / jnp.sqrt(d_in)
    b1 = jnp.zeros((1, hidden_size), jnp.float32)
    w2 = jax.random.normal(k2, (hidden_size, hidden_size), jnp.float32) / jnp.sqrt(hidden_size)
    b2 = jnp.zeros((1, hidden_size), jnp.float32)
    w3 = jax.random.normal(k3, (hidden_size, num_options), jnp.float32) / jnp.sqrt(hidden_size)
    shared_bias = jnp.zeros((1, 1), jnp.float32)  # SingleSharedBias inits to zero
    return (w1, b1, w2, b2, w3, shared_bias)


def _reference(action_output, x, params):
    w1, b1, w2, b2, w3, sb = params
    cat = jnp.concatenate((x, action_output), axis=-1)
    h = (cat @ w1 + b1) @ w2 + b2
    return h @ w3 + sb


if __name__ == "__main__":
    key = jax.random.PRNGKey(0)

    in_features = 16
    action_vector_size = 16
    num_options = 8
    hidden_size = 64

    kp, kx, ka, kx2, ka2 = jax.random.split(key, 5)
    params = init_params(kp, in_features, action_vector_size, num_options, hidden_size)

    # Case 1: tiny batch (single tile, grid of 1).
    batch = 8
    x = jax.random.normal(kx, (batch, in_features), jnp.float32)
    action_output = jax.random.normal(ka, (batch, action_vector_size), jnp.float32)

    q_bf16 = jax.block_until_ready(option_linear_q_forward(action_output, x, params))
    q_f32 = jax.block_until_ready(
        option_linear_q_forward(action_output, x, params, compute_dtype=jnp.float32))
    ref = _reference(action_output, x, params)
    assert q_bf16.shape == (batch, num_options)
    assert jnp.allclose(q_bf16, ref, atol=5e-2, rtol=5e-2), "bf16-path mismatch"
    assert jnp.allclose(q_f32, ref, atol=1e-3, rtol=1e-3), "f32-path mismatch"

    # Case 2: batch that is not a multiple of the tile -> exercises padding and a
    # 2-step "parallel" grid (megacore sharding path on v7x).
    batch2 = 50
    x2 = jax.random.normal(kx2, (batch2, in_features), jnp.float32)
    a2 = jax.random.normal(ka2, (batch2, action_vector_size), jnp.float32)
    q2 = jax.block_until_ready(option_linear_q_forward(a2, x2, params))
    ref2 = _reference(a2, x2, params)
    assert q2.shape == (batch2, num_options)
    assert jnp.allclose(q2, ref2, atol=5e-2, rtol=5e-2), "mismatch vs reference (case 2)"

    # TODO(synk): DiscreteActionValueHead returns a DiscreteActionValue wrapper
    # (greedy_actions / max / evaluate_actions); the underlying q-values tensor
    # is what the kernel produces — the wrapper object itself has no Pallas analog.

    print("KERNEL_OK")
</pallas_src>

<mosaic_0001>
module attributes {stable_mosaic.version = 11 : i64} {
  func.func @_q_kernel(%arg0: i32, %arg1: memref<16x16xbf16, #tpu.memory_space<vmem>>, %arg2: memref<16x16xbf16, #tpu.memory_space<vmem>>, %arg3: memref<16x128xbf16, #tpu.memory_space<vmem>>, %arg4: memref<16x128xbf16, #tpu.memory_space<vmem>>, %arg5: memref<1x128xf32, #tpu.memory_space<vmem>>, %arg6: memref<128x128xbf16, #tpu.memory_space<vmem>>, %arg7: memref<1x128xf32, #tpu.memory_space<vmem>>, %arg8: memref<128x8xf32, #tpu.memory_space<vmem>>, %arg9: memref<1x1xf32, #tpu.memory_space<smem>>, %arg10: memref<16x8xf32, #tpu.memory_space<vmem>>) attributes {dimension_semantics = [#tpu.dimension_semantics<parallel>], iteration_bounds = array<i64: 1>, scalar_prefetch = 0 : i64, scratch_operands = 0 : i64, tpu.core_type = #tpu.core_type<tc>, window_params = [{transform_indices = @transform_0, window_bounds = array<i64: 16, 16>}, {transform_indices = @transform_1, window_bounds = array<i64: 16, 16>}, {pipeline_mode = #tpu.pipeline_mode<synchronous>, transform_indices = @transform_2, window_bounds = array<i64: 16, 128>}, {pipeline_mode = #tpu.pipeline_mode<synchronous>, transform_indices = @transform_3, window_bounds = array<i64: 16, 128>}, {pipeline_mode = #tpu.pipeline_mode<synchronous>, transform_indices = @transform_4, window_bounds = array<i64: 1, 128>}, {pipeline_mode = #tpu.pipeline_mode<synchronous>, transform_indices = @transform_5, window_bounds = array<i64: 128, 128>}, {pipeline_mode = #tpu.pipeline_mode<synchronous>, transform_indices = @transform_6, window_bounds = array<i64: 1, 128>}, {pipeline_mode = #tpu.pipeline_mode<synchronous>, transform_indices = @transform_7, window_bounds = array<i64: 128, 8>}, {transform_indices = @transform_8, window_bounds = array<i64: 1, 1>}, {transform_indices = @transform_9, window_bounds = array<i64: 16, 8>}]} {
    %c0 = arith.constant 0 : index
    %c0_0 = arith.constant 0 : index
    %0 = vector.load %arg1[%c0, %c0_0] : memref<16x16xbf16, #tpu.memory_space<vmem>>, vector<16x16xbf16>
    %c0_1 = arith.constant 0 : index
    %c0_2 = arith.constant 0 : index
    %1 = vector.load %arg3[%c0_1, %c0_2] : memref<16x128xbf16, #tpu.memory_space<vmem>>, vector<16x128xbf16>
    %cst = arith.constant dense<0.000000e+00> : vector<16x128xf32>
    %2 = tpu.matmul %0, %1, %cst {dimension_numbers = #tpu.dot_dimension_numbers<[1], [0], [0], [1], [0, 0, 1, 1], [], []>} : vector<16x16xbf16>, vector<16x128xbf16>, vector<16x128xf32> -> vector<16x128xf32>
    %c0_3 = arith.constant 0 : index
    %c0_4 = arith.constant 0 : index
    %3 = vector.load %arg2[%c0_3, %c0_4] : memref<16x16xbf16, #tpu.memory_space<vmem>>, vector<16x16xbf16>
    %c0_5 = arith.constant 0 : index
    %c0_6 = arith.constant 0 : index
    %4 = vector.load %arg4[%c0_5, %c0_6] : memref<16x128xbf16, #tpu.memory_space<vmem>>, vector<16x128xbf16>
    %cst_7 = arith.constant dense<0.000000e+00> : vector<16x128xf32>
    %5 = tpu.matmul %3, %4, %cst_7 {dimension_numbers = #tpu.dot_dimension_numbers<[1], [0], [0], [1], [0, 0, 1, 1], [], []>} : vector<16x16xbf16>, vector<16x128xbf16>, vector<16x128xf32> -> vector<16x128xf32>
    %6 = arith.addf %2, %5 : vector<16x128xf32>
    %c0_8 = arith.constant 0 : index
    %c0_9 = arith.constant 0 : index
    %7 = vector.load %arg5[%c0_8, %c0_9] : memref<1x128xf32, #tpu.memory_space<vmem>>, vector<1x128xf32>
    %8 = vector.broadcast %7 : vector<1x128xf32> to vector<16x128xf32>
    %9 = arith.addf %6, %8 : vector<16x128xf32>
    %10 = arith.truncf %9 : vector<16x128xf32> to vector<16x128xbf16>
    %c0_10 = arith.constant 0 : index
    %c0_11 = arith.constant 0 : index
    %11 = vector.load %arg6[%c0_10, %c0_11] : memref<128x128xbf16, #tpu.memory_space<vmem>>, vector<128x128xbf16>
    %cst_12 = arith.constant dense<0.000000e+00> : vector<16x128xf32>
    %12 = tpu.matmul %10, %11, %cst_12 {dimension_numbers = #tpu.dot_dimension_numbers<[1], [0], [0], [1], [0, 0, 1, 1], [], []>} : vector<16x128xbf16>, vector<128x128xbf16>, vector<16x128xf32> -> vector<16x128xf32>
    %c0_13 = arith.constant 0 : index
    %c0_14 = arith.constant 0 : index
    %13 = vector.load %arg7[%c0_13, %c0_14] : memref<1x128xf32, #tpu.memory_space<vmem>>, vector<1x128xf32>
    %14 = vector.broadcast %13 : vector<1x128xf32> to vector<16x128xf32>
    %15 = arith.addf %12, %14 : vector<16x128xf32>
    %c0_15 = arith.constant 0 : index
    %c0_16 = arith.constant 0 : index
    %16 = vector.load %arg8[%c0_15, %c0_16] : memref<128x8xf32, #tpu.memory_space<vmem>>, vector<128x8xf32>
    %cst_17 = arith.constant dense<0.000000e+00> : vector<16x8xf32>
    %17 = tpu.matmul %15, %16, %cst_17 {dimension_numbers = #tpu.dot_dimension_numbers<[1], [0], [0], [1], [0, 0, 1, 1], [], []>} : vector<16x128xf32>, vector<128x8xf32>, vector<16x8xf32> -> vector<16x8xf32>
    %c0_18 = arith.constant 0 : index
    %c0_19 = arith.constant 0 : index
    %18 = memref.load %arg9[%c0_18, %c0_19] : memref<1x1xf32, #tpu.memory_space<smem>>
    %19 = vector.broadcast %18 : f32 to vector<16x8xf32>
    %20 = arith.addf %17, %19 : vector<16x8xf32>
    %c0_20 = arith.constant 0 : index
    %c0_21 = arith.constant 0 : index
    %21 = vector.load %arg10[%c0_20, %c0_21] : memref<16x8xf32, #tpu.memory_space<vmem>>, vector<16x8xf32>
    tpu.vector_store %arg10[%c0_20, %c0_21], %20 {strides = array<i32>} : memref<16x8xf32, #tpu.memory_space<vmem>>, vector<16x8xf32>,
    return
  }
  func.func @transform_0(%arg0: i32) -> (i32, i32) {
    %c0_i32 = arith.constant 0 : i32
    %c0_i32_0 = arith.constant 0 : i32
    return %arg0, %c0_i32 : i32, i32
  }
  func.func @transform_1(%arg0: i32) -> (i32, i32) {
    %c0_i32 = arith.constant 0 : i32
    %c0_i32_0 = arith.constant 0 : i32
    return %arg0, %c0_i32 : i32, i32
  }
  func.func @transform_2(%arg0: i32) -> (i32, i32) {
    %c0_i32 = arith.constant 0 : i32
    %c0_i32_0 = arith.constant 0 : i32
    %c0_i32_1 = arith.constant 0 : i32
    return %c0_i32, %c0_i32_0 : i32, i32
  }
  func.func @transform_3(%arg0: i32) -> (i32, i32) {
    %c0_i32 = arith.constant 0 : i32
    %c0_i32_0 = arith.constant 0 : i32
    %c0_i32_1 = arith.constant 0 : i32
    return %c0_i32, %c0_i32_0 : i32, i32
  }
  func.func @transform_4(%arg0: i32) -> (i32, i32) {
    %c0_i32 = arith.constant 0 : i32
    %c0_i32_0 = arith.constant 0 : i32
    %c0_i32_1 = arith.constant 0 : i32
    return %c0_i32, %c0_i32_0 : i32, i32
  }
  func.func @transform_5(%arg0: i32) -> (i32, i32) {
    %c0_i32 = arith.constant 0 : i32
    %c0_i32_0 = arith.constant 0 : i32
    %c0_i32_1 = arith.constant 0 : i32
    return %c0_i32, %c0_i32_0 : i32, i32
  }
  func.func @transform_6(%arg0: i32) -> (i32, i32) {
    %c0_i32 = arith.constant 0 : i32
    %c0_i32_0 = arith.constant 0 : i32
    %c0_i32_1 = arith.constant 0 : i32
    return %c0_i32, %c0_i32_0 : i32, i32
  }
  func.func @transform_7(%arg0: i32) -> (i32, i32) {
    %c0_i32 = arith.constant 0 : i32
    %c0_i32_0 = arith.constant 0 : i32
    %c0_i32_1 = arith.constant 0 : i32
    return %c0_i32, %c0_i32_0 : i32, i32
  }
  func.func @transform_8(%arg0: i32) -> (i32, i32) {
    %c0_i32 = arith.constant 0 : i32
    %c0_i32_0 = arith.constant 0 : i32
    %c0_i32_1 = arith.constant 0 : i32
    return %c0_i32, %c0_i32_0 : i32, i32
  }
  func.func @transform_9(%arg0: i32) -> (i32, i32) {
    %c0_i32 = arith.constant 0 : i32
    %c0_i32_0 = arith.constant 0 : i32
    return %arg0, %c0_i32 : i32, i32
  }
}

</mosaic_0001>

<bundles_post_ra>
// kernel: tpu_custom_call.1
= control target key start
LH: loop header
LB: loop body
LE: loop exit
PB: predicated region body
PF: predicated region fallthrough
CT: control target
= control target key end

     0   :  { %v535_v0 = vmov 0.0   ;;  %vm536_vm0 = vmmov 0   ;;  %vm53_vm1 = vcmask 130048   ;;  %vm368_vm2 = vcmask 64512   ;;  %s689_s3 = inlined_call_operand.vmem [shape: bf16[16,128], index: 3, kind: input, shape index: {}]   ;;  %s690_s2 = inlined_call_operand.vmem [shape: bf16[16,128], index: 2, kind: input, shape index: {}]   ;;  %s691_s1 = inlined_call_operand.vmem [shape: bf16[16,16], index: 1, kind: input, shape index: {}]   ;;  %s692_s0 = inlined_call_operand.vmem [shape: bf16[16,16], index: 0, kind: input, shape index: {}]   ;;  %s693_s5 = inlined_call_operand.vmem [shape: bf16[128,128], index: 5, kind: input, shape index: {}]   ;;  %s694_s7 = inlined_call_operand.vmem [shape: f32[128,8], index: 7, kind: input, shape index: {}]   ;;  %s695_s4 = inlined_call_operand.vmem [shape: f32[1,128], index: 4, kind: input, shape index: {}]   ;;  %s696_s6 = inlined_call_operand.vmem [shape: f32[1,128], index: 6, kind: input, shape index: {}]   ;;  %s697_s8 = inlined_call_operand.<no memory space> [shape: f32[1,1], index: 8, kind: input, shape index: {}]   ;;  %s698_s9 = inlined_call_operand.vmem [shape: f32[16,8], index: 9, kind: output, shape index: {}]  }
   0x1   :  { %422 = vmatprep.subr.bf16.mxu0 %v535_v0  ;;  %428 = vmatprep.subr.bf16.mxu1 %v535_v0  ;;  %v523_v1 = vld [vmem:[%s689_s3] sm:$0xff]   ;;  %v528_v6 = vld [vmem:[%s693_s5 + $0x8] sm:$0xff]   ;;  %v529_v7 = vld [vmem:[%s693_s5 + $0x10] sm:$0xff]   ;;  %v292_v58 = vstv %s697_s8 }
   0x2   :  { %v524_v2 = vld [vmem:[%s690_s2] sm:$0xff]   ;;  %424 = vmatprep.mubr.msk.bf16.mxu0 %vm536_vm0, %v535_v0  ;;  %430 = vmatprep.mubr.msk.bf16.mxu1 %vm536_vm0, %v535_v0  ;;  %v530_v8 = vld [vmem:[%s693_s5 + $0x18] sm:$0xff]   ;;  %v532_v10 = vld [vmem:[%s693_s5 + $0x28] sm:$0xff]  }
   0x3   :  { %423 = vmatpush3.bf16.msra.mxu0 %v523_v1  ;;  %v525_v3 = vld [vmem:[%s691_s1] sm:$0xff]   ;;  %429 = vmatpush3.bf16.msra.mxu1 %v524_v2  ;;  %v533_v11 = vld [vmem:[%s693_s5 + $0x30] sm:$0xff]   ;;  %v534_v12 = vld [vmem:[%s693_s5 + $0x38] sm:$0xff]  }
   0x4   :  { %v526_v4 = vld [vmem:[%s692_s0] sm:$0xff]   ;;  %434 = vmatprep.subr.bf16.mxu0 %v535_v0  ;;  %v276_v14 = vld [vmem:[%s694_s7 + $0x8] sm:$0xff]  ;;  %v277_v15 = vld [vmem:[%s694_s7 + $0x10] sm:$0xff] }
   0x5   :  { %v527_v5 = vld [vmem:[%s693_s5] sm:$0xff]   ;;  %v278_v17 = vld [vmem:[%s694_s7 + $0x18] sm:$0xff]  ;;  %v280_v20 = vld [vmem:[%s694_s7 + $0x28] sm:$0xff] }
   0x6   :  { %425 = vmatmul.mubr.msk.bf16.vlgmr.msra.gmra.mrb[0].mxu0 %vm53_vm1, %v525_v3  ;;  %431 = vmatmul.mubr.msk.bf16.vlgmr.msra.gmra.mrb[0].mxu1 %vm53_vm1, %v526_v4  ;;  %v531_v9 = vld [vmem:[%s693_s5 + $0x20] sm:$0xff]   ;;  %v493_v18 = vpack.c.bf16 %v278_v17, %v277_v15  ;;  %v281_v22 = vld [vmem:[%s694_s7 + $0x30] sm:$0xff]  ;;  %v282_v23 = vld [vmem:[%s694_s7 + $0x38] sm:$0xff] }
   0x7   :  { %435 = vmatpush3.bf16.msra.mxu0 %v527_v5  ;;  %450 = vmatprep.mubr.msk.bf16.mxu0 %vm536_vm0, %v535_v0  ;;  %v275_v13 = vld [vmem:[%s694_s7] sm:$0xff]  ;;  %v501_v24 = vpack.c.bf16 %v282_v23, %v281_v22  ;;  %v284_v26 = vld [vmem:[%s694_s7 + $0x48] sm:$0xff]  ;;  %v285_v28 = vld [vmem:[%s694_s7 + $0x50] sm:$0xff] }
   0x8   :  { %436 = vmatprep.subr.bf16.mxu0 %v535_v0  ;;  %v489_v16 = vpack.c.bf16 %v276_v14, %v275_v13  ;;  %v279_v19 = vld [vmem:[%s694_s7 + $0x20] sm:$0xff]  ;;  %v286_v29 = vld [vmem:[%s694_s7 + $0x58] sm:$0xff]  ;;  %v288_v32 = vld [vmem:[%s694_s7 + $0x68] sm:$0xff] }
   0x9   :  { %v497_v21 = vpack.c.bf16 %v280_v20, %v279_v19  ;;  %v283_v25 = vld [vmem:[%s694_s7 + $0x40] sm:$0xff]  ;;  %v509_v30 = vpack.c.bf16 %v286_v29, %v285_v28  ;;  %v289_v48 = vld [vmem:[%s694_s7 + $0x70] sm:$0xff]  ;;  %v290_v49 = vld [vmem:[%s694_s7 + $0x78] sm:$0xff] }
   0xa   :  { %490 = vmatprep.subr.bf16.mxu1 %v489_v16  ;;  %v505_v27 = vpack.c.bf16 %v284_v26, %v283_v25  ;;  %v287_v31 = vld [vmem:[%s694_s7 + $0x60] sm:$0xff]  ;;  %v517_v50 = vpack.c.bf16 %v290_v49, %v289_v48 }
   0xb   :  { %437 = vmatpush3.bf16.msra.mxu0 %v528_v6  ;;  %492 = vmatpush3.bf16.msra.mxu1 %v489_v16  ;;  %v513_v33 = vpack.c.bf16 %v288_v32, %v287_v31  ;;  %v381_v40 = vld [vmem:[%s695_s4] ss:$0 sm:$0xff] }
   0xc   :  { %438 = vmatprep.subr.bf16.mxu0 %v535_v0  ;;  %494 = vmatprep.subr.bf16.mxu1 %v493_v18  ;;  %v382_v51 = vld [vmem:[%s696_s6] ss:$0 sm:$0xff] }
   0xf   :  { %439 = vmatpush3.bf16.msra.mxu0 %v529_v7  ;;  %496 = vmatpush3.bf16.msra.mxu1 %v493_v18 }
  0x10   :  { %440 = vmatprep.subr.bf16.mxu0 %v535_v0  ;;  %498 = vmatprep.subr.bf16.mxu1 %v497_v21 }
  0x13   :  { %441 = vmatpush3.bf16.msra.mxu0 %v530_v8  ;;  %500 = vmatpush3.bf16.msra.mxu1 %v497_v21 }
  0x14   :  { %442 = vmatprep.subr.bf16.mxu0 %v535_v0  ;;  %502 = vmatprep.subr.bf16.mxu1 %v501_v24 }
  0x17   :  { %443 = vmatpush3.bf16.msra.mxu0 %v531_v9  ;;  %504 = vmatpush3.bf16.msra.mxu1 %v501_v24 }
  0x18   :  { %444 = vmatprep.subr.bf16.mxu0 %v535_v0  ;;  %506 = vmatprep.subr.bf16.mxu1 %v505_v27 }
  0x1b   :  { %445 = vmatpush3.bf16.msra.mxu0 %v532_v10  ;;  %508 = vmatpush3.bf16.msra.mxu1 %v505_v27 }
  0x1c   :  { %446 = vmatprep.subr.bf16.mxu0 %v535_v0  ;;  %510 = vmatprep.subr.bf16.mxu1 %v509_v30 }
  0x1f   :  { %447 = vmatpush3.bf16.msra.mxu0 %v533_v11  ;;  %512 = vmatpush3.bf16.msra.mxu1 %v509_v30 }
  0x20   :  { %448 = vmatprep.subr.bf16.mxu0 %v535_v0  ;;  %514 = vmatprep.subr.bf16.mxu1 %v513_v33 }
  0x23   :  { %449 = vmatpush3.bf16.msra.mxu0 %v534_v12  ;;  %516 = vmatpush3.bf16.msra.mxu1 %v513_v33 }
  0x24   :  { %518 = vmatprep.subr.bf16.mxu1 %v517_v50 }
  0x27   :  { %520 = vmatpush3.bf16.msra.mxu1 %v517_v50 }
  0xd9   :  { %v91_v34 = vpop.f32.mrb[0].mxu0  ;;  %v146_v35 = vpop.f32.mrb[0].mxu1 }
  0xda   :  { %v426_v36 = vpop.f32.mrb[1].mxu0  ;;  %v147_v37 = vadd.f32 %v146_v35, %v91_v34  ;;  %v432_v38 = vpop.f32.mrb[1].mxu1 }
  0xdb   :  { %v94_v39 = vpop.f32.mrb[2].mxu0  ;;  %v149_v41 = vpop.f32.mrb[2].mxu1 }
  0xdc   :  { %v427_v42 = vpop.f32.mrb[3].mxu0  ;;  %v150_v43 = vadd.f32 %v149_v41, %v94_v39  ;;  %v433_v44 = vpop.f32.mrb[3].mxu1  ;;  %v160_v45 = vadd.f32 %v381_v40, %v147_v37 }
  0xde   :  { %v161_v46 = vadd.f32 %v381_v40, %v150_v43 }
  0xe0   :  { %v162_v47 = vpack.c.bf16 %v161_v46, %v160_v45 }
  0xe2   :  { %451 = vmatmul.mubr.bf16.vlgmr.msra.gmra.mrb[4].mxu0 %v162_v47 }
 0x1b5   :  { %v268_v52 = vpop.f32.mrb[4].mxu0 }
 0x1b6   :  { %v269_v53 = vadd.f32 %v382_v51, %v268_v52  ;;  %v452_v54 = vpop.f32.mrb[5].mxu0 }
 0x1b7   :  { %v271_v55 = vpop.f32.mrb[6].mxu0 }
 0x1b8   :  { %v272_v56 = vadd.f32 %v382_v51, %v271_v55  ;;  %v453_v57 = vpop.f32.mrb[7].mxu0  ;;  %486 = vmatprep.mubr.f32.mxu1 %v269_v53 }
 0x1ba   :  { %487 = vmatmul.mubr.f32.vlgmr.msra.gmra.mrb[4].mxu1 %v272_v56 }
 0x28d   :  { %v488_v59 = vpop.f32.mrb[4].mxu1 }
 0x28e   :  { %v365_v60 = vadd.f32 %v488_v59, %v292_v58  ;;  %v359_v61 = vpop.f32.mrb[5].mxu1 }
 0x28f   :  { %v360_v62 = vadd.f32 %v359_v61, %v292_v58 }
 0x290   :  { %370 = vst.msk [vmem:[%s698_s9 + $0x8] sm:$0xff] %vm368_vm2, %v365_v60 }
 0x291   :  { %369 = vst.msk [vmem:[%s698_s9] sm:$0xff] %vm368_vm2, %v360_v62 }

</bundles_post_ra>
